<compile_context>
chip_gen: v7x
topology: tpu7x:2x2x1
jax: 0.10.0
libtpu: 0.0.40
codegen_flags: <defaults>
</compile_context>

<pallas_src>
import math

import jax
import jax.numpy as jnp
from jax.experimental import pallas as pl
from jax.experimental.pallas import tpu as pltpu


def _add_pe_kernel(x_ref, pe_ref, o_ref):
    # x_ref / o_ref: (tS, B, D); pe_ref: (tS, 1, D) -> broadcasts over the batch axis.
    o_ref[...] = x_ref[...] + pe_ref[...]


def make_pe_table(d_model: int, max_len: int = 5000, dtype=jnp.float32):
    """Positional-encoding buffer, identical to the PyTorch __init__ (shape (max_len, 1, d_model))."""
    position = jnp.arange(max_len, dtype=jnp.float32)[:, None]                      # (max_len, 1)
    div_term = jnp.exp(
        jnp.arange(0, d_model, 2, dtype=jnp.float32) * (-math.log(10000.0) / d_model)
    )                                                                               # (d_model//2,)
    angles = position * div_term                                                    # (max_len, d_model//2)
    pe = jnp.zeros((max_len, d_model), jnp.float32)
    pe = pe.at[:, 0::2].set(jnp.sin(angles))
    pe = pe.at[:, 1::2].set(jnp.cos(angles))
    return pe[:, None, :].astype(dtype)                                             # (max_len, 1, d_model)


def _vmem_capacity_bytes() -> int:
    try:
        return int(pltpu.get_tpu_info().vmem_capacity_bytes)
    except Exception:
        return 64 * 1024 * 1024  # conservative fallback (v7x per-TensorCore VMEM)


def _round_up(x: int, m: int) -> int:
    return -(-x // m) * m


def _seq_tile(seq_len: int, batch: int, d_model: int, itemsize: int,
              tile_budget_bytes: int, min_blocks: int = 4) -> int:
    """Rows of S per block, sized from the VMEM budget using the padded (B, D) slab."""
    sublane = 8 * max(1, 4 // itemsize)            # 8 (f32), 16 (bf16), 32 (int8/fp8)
    slab = _round_up(batch, sublane) * _round_up(d_model, 128) * itemsize
    t = max(1, min(seq_len, tile_budget_bytes // max(1, slab)))
    # Ensure enough blocks to pipeline DMA against compute and to shard across TCs.
    if seq_len >= min_blocks and seq_len // t < min_blocks:
        t = pl.cdiv(seq_len, min_blocks)
    return t


@jax.jit
def positional_encoding(x, pe):
    """x: (S, B, D); pe: (max_len, 1, D). Returns x + pe[:S] (broadcast over batch)."""
    S, B, D = x.shape
    max_len = pe.shape[0]
    assert pe.shape == (max_len, 1, D), f"pe shape {pe.shape} incompatible with x shape {x.shape}"
    assert S <= max_len, f"sequence length {S} exceeds positional-encoding max_len {max_len}"

    itemsize = jnp.dtype(x.dtype).itemsize
    # Generation-aware VMEM budget: 64 MiB scoped on v5e/v6e, 32 MiB on v7x.
    vmem_limit = min(_vmem_capacity_bytes() // 2, 64 * 1024 * 1024)
    tile_budget = vmem_limit // 6   # 2x(in + out) double-buffered tiles + pe + headroom
    tS = _seq_tile(S, B, D, itemsize, tile_budget)
    grid = (pl.cdiv(S, tS),)

    out = pl.pallas_call(
        _add_pe_kernel,
        out_shape=jax.ShapeDtypeStruct((S, B, D), x.dtype),
        grid=grid,
        in_specs=[
            pl.BlockSpec((tS, B, D), lambda i: (i, 0, 0)),
            pl.BlockSpec((tS, 1, D), lambda i: (i, 0, 0)),
        ],
        out_specs=pl.BlockSpec((tS, B, D), lambda i: (i, 0, 0)),
        compiler_params=pltpu.CompilerParams(
            dimension_semantics=("parallel",),
            vmem_limit_bytes=vmem_limit,
        ),
        cost_estimate=pl.CostEstimate(
            flops=S * B * D,
            transcendentals=0,
            bytes_accessed=(2 * S * B + S) * D * itemsize,
        ),
    )(x, pe.astype(x.dtype))
    # TODO(synk): add donate_argnums + input_output_aliases for in-place semantics at
    # production sizes when the caller no longer needs x.
    return out


if __name__ == "__main__":
    seq_len, batch, d_model = 8, 2, 32
    max_len = 64

    key = jax.random.PRNGKey(0)
    x = jax.random.normal(key, (seq_len, batch, d_model), dtype=jnp.float32)

    pe = make_pe_table(d_model, max_len=max_len, dtype=jnp.float32)

    out = jax.block_until_ready(positional_encoding(x, pe))

    # Reference check (plain JAX) — same broadcast-add semantics as the PyTorch forward.
    ref = x + pe[:seq_len]
    assert out.shape == (seq_len, batch, d_model)
    assert jnp.allclose(out, ref, atol=1e-6), "mismatch vs reference"

    print("KERNEL_OK")
</pallas_src>

<mosaic_0001>
module attributes {stable_mosaic.version = 11 : i64} {
  func.func @_add_pe_kernel(%arg0: i32, %arg1: memref<2x2x32xf32, #tpu.memory_space<vmem>>, %arg2: memref<2x1x32xf32, #tpu.memory_space<vmem>>, %arg3: memref<2x2x32xf32, #tpu.memory_space<vmem>>) attributes {dimension_semantics = [#tpu.dimension_semantics<parallel>], iteration_bounds = array<i64: 4>, scalar_prefetch = 0 : i64, scratch_operands = 0 : i64, tpu.core_type = #tpu.core_type<tc>, window_params = [{transform_indices = @transform_0, window_bounds = array<i64: 2, 2, 32>}, {transform_indices = @transform_1, window_bounds = array<i64: 2, 1, 32>}, {transform_indices = @transform_2, window_bounds = array<i64: 2, 2, 32>}]} {
    %c0 = arith.constant 0 : index
    %c0_0 = arith.constant 0 : index
    %c0_1 = arith.constant 0 : index
    %0 = vector.load %arg1[%c0, %c0_0, %c0_1] : memref<2x2x32xf32, #tpu.memory_space<vmem>>, vector<2x2x32xf32>
    %c0_2 = arith.constant 0 : index
    %c0_3 = arith.constant 0 : index
    %c0_4 = arith.constant 0 : index
    %1 = vector.load %arg2[%c0_2, %c0_3, %c0_4] : memref<2x1x32xf32, #tpu.memory_space<vmem>>, vector<2x1x32xf32>
    %2 = vector.broadcast %1 : vector<2x1x32xf32> to vector<2x2x32xf32>
    %3 = arith.addf %0, %2 : vector<2x2x32xf32>
    %c0_5 = arith.constant 0 : index
    %c0_6 = arith.constant 0 : index
    %c0_7 = arith.constant 0 : index
    %4 = vector.load %arg3[%c0_5, %c0_6, %c0_7] : memref<2x2x32xf32, #tpu.memory_space<vmem>>, vector<2x2x32xf32>
    tpu.vector_store %arg3[%c0_5, %c0_6, %c0_7], %3 {strides = array<i32>} : memref<2x2x32xf32, #tpu.memory_space<vmem>>, vector<2x2x32xf32>,
    return
  }
  func.func @transform_0(%arg0: i32) -> (i32, i32, i32) {
    %c0_i32 = arith.constant 0 : i32
    %c0_i32_0 = arith.constant 0 : i32
    %c0_i32_1 = arith.constant 0 : i32
    return %arg0, %c0_i32, %c0_i32_0 : i32, i32, i32
  }
  func.func @transform_1(%arg0: i32) -> (i32, i32, i32) {
    %c0_i32 = arith.constant 0 : i32
    %c0_i32_0 = arith.constant 0 : i32
    %c0_i32_1 = arith.constant 0 : i32
    return %arg0, %c0_i32, %c0_i32_0 : i32, i32, i32
  }
  func.func @transform_2(%arg0: i32) -> (i32, i32, i32) {
    %c0_i32 = arith.constant 0 : i32
    %c0_i32_0 = arith.constant 0 : i32
    %c0_i32_1 = arith.constant 0 : i32
    return %arg0, %c0_i32, %c0_i32_0 : i32, i32, i32
  }
}

</mosaic_0001>

<bundles_post_ra>
// kernel: positional_encoding.1
= control target key start
LH: loop header
LB: loop body
LE: loop exit
PB: predicated region body
PF: predicated region fallthrough
CT: control target
= control target key end

     0   :  { %7 = vsyncpa [#allocation3], 0  ;;  %s514_s0 = inlined_call_operand.vmem [shape: f32[8,2,32], index: 0, kind: input, shape index: {}]   ;;  %s515_s1 = inlined_call_operand.vmem [shape: f32[64,1,32], index: 1, kind: input, shape index: {}]   ;;  %s516_s2 = inlined_call_operand.hbm [shape: f32[8,2,32], index: 2, kind: output, shape index: {}]  }
   0x1   :  { %9 = vsyncpa [#allocation3 + $0x1], 0  ;;  %s409_s9 = smov 0   ;;  %s411_s10 = smov 0  }
   0x2   :  { %s413_s11 = smov 0   ;;  %s415_s12 = smov 0  }
   0x3 LB: > { %s430_s13 = sadd.s32 4294967295, %s389_s12   ;;  %s270_s14 = sadd.s32 4294967294, %s389_s12   ;;  %s389_s12 = sphi %s415_s12, %s522_s12   ;;  %s385_s11 = sphi %s413_s11, %s521_s11   ;;  %s381_s10 = sphi %s411_s10, %s520_s10   ;;  %s377_s9 = sphi %s409_s9, %s519_s9  }
   0x4   : > { %s434_s15 = sadd.s32 1, %s389_s12   ;;  %s74_s16 = sadd.s32 1, %s385_s11 }
   0x5   : > { %s71_s17 = ssub.s32 %s389_s12, %s434_s15  ;;  %p84_p0 = scmp.ne.s32.totalorder %s385_s11, %s381_s10 }
   0x6   : > { %p72_p1 = scmp.eq.s32.totalorder %s71_s17, 0  ;;  %p85_p2 = scmp.eq.s32.totalorder %s430_s13, 3 }
   0x7   : > { %p90_p3 = scmp.ne.s32.totalorder %s381_s10, %s377_s9  ;;  %p91_p4 = scmp.eq.s32.totalorder %s270_s14, 3 }
   0x8   : > { %s445_s18 = scalar_select %p72_p1, %s385_s11, %s74_s16  }
   0x9   : > { %p447_p5 = por %p85_p2, %p84_p0  ;;  %p451_p6 = por %p91_p4, %p90_p3 }
   0xa   : > { %p273_p7 = scmp.ge.s32.totalorder %s389_s12, 1  ;;  %p126_p8 = scmp.lt.s32.totalorder %s389_s12, 5 }
   0xc   : > { %p127_p9 = pnand %p273_p7, %p126_p8 }
   0xd   : > { %s149_s21 = sand.u32 (!%p127_p9), 1, %s381_s10   ;;  %s275_s22 = sshll.u32 (!%p127_p9), %s430_s13, 1  ;;  %vm182_vm0 = vcmask (!%p127_p9), 254976  }
   0xe   : > { %130 = sbr.rel (%p127_p9) target bundleno = 47 (0x2f), region = 28  ;;  %s274_s23 = sshll.u32 (!%p127_p9), %s149_s21, 2 }
   0xf   : > { %p153_p10 = scmp.lt.s32.totalorder (!%p127_p9), %s275_s22, 7  ;;  %p159_p11 = scmp.lt.s32.totalorder (!%p127_p9), %s275_s22, 63 }
  0x10   : > { %s151_s4 = scalar_lea.vmem (!%p127_p9), [#allocation2], %s274_s23  ;;  %s285_s6 = sshll.u32 (!%p127_p9), %s430_s13, 6 }
  0x11   : > { %s199_s5 = sshll.u32 (!%p127_p9), %s151_s4, 4  ;;  %s471_s14 = scalar_lea.hbm (!%p127_p9), %s516_s2, %s285_s6  ;;  %s466_s5 = int_to_ptr.vmem [resolvable:$true] %s199_s5 }
  0x12   : > { %s473_s16 = scalar_lea.sflag (!%p127_p9), [#allocation3], %s149_s21  ;;  %s327_s17 = scalar_lea.vmem (!%p127_p9), %s466_s5, 64 }
  0x13   : > { %p328_p12 = scmp.ne.s32.totalorder (!%p127_p9), %s466_s5, %s327_s17  ;;  %s391_s13 = smov (!%p127_p9), [#allocation2]  }
  0x15   : > { %s154_s24 = scalar_select %p153_p10, %s275_s22, 7 }
  0x16   : > { %s524_s22 = smov (!%p159_p11, %s275_s22), 63  ;;  %p329_p13 = pnand %p328_p12, %p447_p5 }
  0x17   : > { %s276_s25 = sshll.u32 %s154_s24, 1  ;;  %s161_s3 = scalar_lea.vmem %s515_s1, %s524_s22 }
  0x18   : > { %s156_s28 = scalar_lea.vmem %s514_s0, %s276_s25  ;;  %v278_v1 = vld [vmem:[%s161_s3] ss:$0 sm:$0xff]  ;;  %v279_v4 = vld [vmem:[%s161_s3 + $0x1] ss:$0 sm:$0xff]  ;;  %p330_p0 = pneg %p329_p13 }
  0x19   : > { %v164_v0 = vld [vmem:[%s156_s28] sm:$0x3]  ;;  %v165_v3 = vld [vmem:[%s156_s28 + $0x2] sm:$0x3]  ;;  %s331_s22 = sshll.u32 %s391_s13, 4  ;;  %s332_s22 = int_to_ptr.vmem [resolvable:$false] %s331_s22 }
  0x1a   : > { %v180_v2 = vadd.f32 %v278_v1, %v164_v0  ;;  %v181_v5 = vadd.f32 %v279_v4, %v165_v3  ;;  %s333_s23 = scalar_lea.vmem %s332_s22, 128  ;;  %p334_p1 = scmp.lt.s32.totalorder %s466_s5, %s332_s22 }
  0x1b   : > { %p335_p2 = scmp.lt.s32.totalorder %s333_s23, %s327_s17 }
  0x1c   : > { %183 = vst.msk [vmem:[%s151_s4] sm:$0x3] %vm182_vm0, %v180_v2  ;;  %184 = vst.msk [vmem:[%s151_s4 + $0x2] sm:$0x3] %vm182_vm0, %v181_v5 }
  0x1d   : > { %p336_p3 = por %p335_p2, %p334_p1 }
  0x1f   : > { %p337_p4 = pnand %p336_p3, %p330_p0 }
  0x21   : > { %340 = shalt.err (!%p337_p4)
}
  0x22   : > { %s341_s21 = scalar_lea.hbm %s471_s14, 64  ;;  %s345_s26 = scalar_lea.hbm %s516_s2, 256 }
  0x23   : > { %p342_p7 = scmp.ne.s32.totalorder %s471_s14, %s341_s21  ;;  %p346_p10 = scmp.lt.u32.totalorder %s471_s14, %s516_s2 }
  0x24   : > { %p347_p11 = scmp.lt.u32.totalorder %s345_s26, %s341_s21  ;;  %p349_p13 = scmp.lt.u32.totalorder %s341_s21, %s471_s14 }
  0x25   : > { %p343_p8 = pnand %p342_p7, %p447_p5 }
  0x26   : > { %p348_p12 = por %p347_p11, %p346_p10 }
  0x27   : > { %p344_p9 = pneg %p343_p8 }
  0x28   : > { %p350_p0 = por %p349_p13, %p348_p12 }
  0x2a   : > { %p351_p1 = pnand %p350_p0, %p344_p9 }
  0x2c   : > { %354 = shalt.err (!%p351_p1)
}
  0x2d   : > { %s392_s29 = smov 32   ;;  %s393_s30 = smov 2  }
  0x2e   : > { %286 = dma.vmem_to_hbm [thread:$0]  (%p447_p5), %s466_s5, 64, %s471_s14, %s473_s16, %s392_s29, %s392_s29, %s393_s30  }
  0x2f PF: > { %p292_p2 = scmp.ge.s32.totalorder %s389_s12, 2  ;;  %s214_s3 = sand.u32 1, %s377_s9  }
  0x30   : > { %s215_s4 = scalar_lea.sflag [#allocation3], %s214_s3 }
  0x31   : > { %p289_p3 = pnand %p292_p2, %p451_p6 }
  0x33   : > { %372 = dma.done.wait (!%p289_p3), %s215_s4, 64  }
  0x34   : > { %374 = vsyncadd (!%p289_p3), %s215_s4, 4294967232  ;;  %p12_p4 = scmp.ge.s32.totalorder %s434_s15, 6   ;;  %s519_s9 = smov %s381_s10 }
  0x35   : > { %s520_s10 = smov %s385_s11  ;;  %s521_s11 = smov %s445_s18 }
  0x36   : > { %s522_s12 = smov %s434_s15  ;;  %14 = sbr.rel (!%p12_p4) target bundleno = 3 (0x3), region = 66 }
  0x3d   :  { %220 = vsyncpa [#allocation3], 1 }
  0x3e   :  { %222 = vsyncpa [#allocation3 + $0x1], 1 }

</bundles_post_ra>
